<compile_context>
chip_gen: v7x
topology: tpu7x:2x2x1
jax: 0.10.0
libtpu: 0.0.40
codegen_flags: <defaults>
</compile_context>

<pallas_src>
import jax
import jax.numpy as jnp
from jax.experimental import pallas as pl
from jax.experimental.pallas import tpu as pltpu

# ---- static model config (deterministic synthetic "checkpoint") -------------
BATCH = 8
IN_FEATURES = 32
HIDDEN = 32
NUM_CLASS = 5
LANES = 128          # TPU lane width; packed weights are lane-dense

assert NUM_CLASS <= LANES, "class-boundary folding assumes NUM_CLASS <= 128"
assert HIDDEN + 1 <= LANES, "need one spare lane for the constant-1 hidden unit"


def patient_group_kernel(x_ref, w1_ref, b1_ref, w2_ref, out_ref):
    # Linear1 + bias -> ReLU, lane-dense (B, 128).
    #   lanes 0..H-1 : real hidden units
    #   lane  H      : constant 1 (zero weights, bias 1) -> carries b2 - cb_j
    #   lanes > H    : inert zeros (zero weights, zero bias, ReLU(0)=0)
    h = jnp.maximum(
        jnp.dot(x_ref[...], w1_ref[...], preferred_element_type=jnp.float32)
        + b1_ref[...],
        0.0,
    )                                                            # (B, 128)

    # Fused Linear2 + b2 - class_boundary:
    #   lane j < C  : score - cb_j
    #   lane j >= C : exactly 0 (zero columns) -> compare is False
    s = jnp.dot(h, w2_ref[...], preferred_element_type=jnp.float32)  # (B, 128)

    comp = (s < 0.0).astype(jnp.int32)                           # (B, 128)
    count = jnp.sum(comp, axis=-1, keepdims=True)                # (B, 1)
    out_ref[...] = (NUM_CLASS - count + 1).astype(jnp.int32)


def make_patient_group_net(w1, b1, w2, b2, class_boundary):
    """Pack weights ONCE and return a jitted forward: x (B, IN) -> (B,) int32."""
    num_class = int(class_boundary.reshape(-1).shape[0])
    assert num_class == NUM_CLASS

    # w1p: (IN, LANES); columns 0..H-1 hold W1, the rest are zero.
    w1p = jnp.zeros((IN_FEATURES, LANES), jnp.float32)
    w1p = w1p.at[:, :HIDDEN].set(w1.astype(jnp.float32))

    # b1p: (1, LANES); columns 0..H-1 hold b1, column H is 1.0 (constant unit).
    b1p = jnp.zeros((1, LANES), jnp.float32)
    b1p = b1p.at[0, :HIDDEN].set(b1.reshape(HIDDEN).astype(jnp.float32))
    b1p = b1p.at[0, HIDDEN].set(1.0)

    # w2p: (LANES, LANES); column j<C = [w2 ; ... ; (b2 - cb_j) at row H ; 0].
    cb = class_boundary.reshape(num_class).astype(jnp.float32)
    w2p = jnp.zeros((LANES, LANES), jnp.float32)
    w2p = w2p.at[:HIDDEN, :num_class].set(
        jnp.broadcast_to(w2.reshape(HIDDEN, 1).astype(jnp.float32),
                         (HIDDEN, num_class)))
    w2p = w2p.at[HIDDEN, :num_class].set(
        b2.astype(jnp.float32).reshape(()) - cb)

    operand_bytes = 4 * (BATCH * IN_FEATURES + w1p.size + b1p.size + w2p.size
                         + BATCH)
    cost = pl.CostEstimate(
        flops=2 * BATCH * (IN_FEATURES * LANES + LANES * LANES),
        transcendentals=0,
        bytes_accessed=operand_bytes,
    )

    kernel = pl.pallas_call(
        patient_group_kernel,
        out_shape=jax.ShapeDtypeStruct((BATCH, 1), jnp.int32),
        in_specs=[
            pl.BlockSpec(memory_space=pltpu.MemorySpace.VMEM),  # x
            pl.BlockSpec(memory_space=pltpu.MemorySpace.VMEM),  # w1p
            pl.BlockSpec(memory_space=pltpu.MemorySpace.VMEM),  # b1p
            pl.BlockSpec(memory_space=pltpu.MemorySpace.VMEM),  # w2p
        ],
        out_specs=pl.BlockSpec(memory_space=pltpu.MemorySpace.VMEM),
        cost_estimate=cost,
    )

    @jax.jit
    def forward(x):
        out = kernel(x.astype(jnp.float32), w1p, b1p, w2p)
        return out[:, 0]

    return forward


def _init_params(key):
    k1, k2, k3, k4 = jax.random.split(key, 4)
    w1 = jax.random.uniform(k1, (IN_FEATURES, HIDDEN), jnp.float32,
                            -1.0 / IN_FEATURES ** 0.5, 1.0 / IN_FEATURES ** 0.5)
    b1 = jax.random.uniform(k2, (1, HIDDEN), jnp.float32,
                            -1.0 / IN_FEATURES ** 0.5, 1.0 / IN_FEATURES ** 0.5)
    w2 = jax.random.uniform(k3, (HIDDEN, 1), jnp.float32,
                            -1.0 / HIDDEN ** 0.5, 1.0 / HIDDEN ** 0.5)
    b2 = jax.random.uniform(k4, (1, 1), jnp.float32,
                            -1.0 / HIDDEN ** 0.5, 1.0 / HIDDEN ** 0.5)
    # class_boundary: monotone thresholds on the scalar score.
    class_boundary = jnp.linspace(-0.5, 0.5, NUM_CLASS, dtype=jnp.float32)
    return w1, b1, w2, b2, class_boundary


def _reference(x, w1, b1, w2, b2, cb):
    # Pure-JAX reference matching the PyTorch forward semantics.
    h = jnp.maximum(x @ w1 + b1, 0.0)
    score = h @ w2 + b2                              # (B, 1)
    comp = score < cb[None, :]                       # (B, C)
    return (NUM_CLASS - comp.sum(-1) + 1).astype(jnp.int32)


if __name__ == "__main__":
    key = jax.random.PRNGKey(0)
    kx, kp = jax.random.split(key)
    x = jax.random.normal(kx, (BATCH, IN_FEATURES), jnp.float32)
    w1, b1, w2, b2, class_boundary = _init_params(kp)

    forward = make_patient_group_net(w1, b1, w2, b2, class_boundary)

    out = forward(x)                       # compile + run
    out = jax.block_until_ready(out)
    out = jax.block_until_ready(forward(x))  # steady-state call (no repacking)

    ref = _reference(x, w1, b1, w2, b2, class_boundary)
    assert out.shape == (BATCH,)
    assert out.dtype == jnp.int32
    assert bool(jnp.all(out == ref))
    print("KERNEL_OK")
</pallas_src>

<mosaic_0001>
module attributes {stable_mosaic.version = 11 : i64} {
  func.func @patient_group_kernel(%arg0: memref<8x32xf32, #tpu.memory_space<vmem>>, %arg1: memref<32x128xf32, #tpu.memory_space<vmem>>, %arg2: memref<1x128xf32, #tpu.memory_space<vmem>>, %arg3: memref<128x128xf32, #tpu.memory_space<vmem>>, %arg4: memref<8x1xi32, #tpu.memory_space<vmem>>) attributes {dimension_semantics = [], scalar_prefetch = 0 : i64, scratch_operands = 0 : i64, tpu.core_type = #tpu.core_type<tc>} {
    %c0 = arith.constant 0 : index
    %c0_0 = arith.constant 0 : index
    %0 = vector.load %arg0[%c0, %c0_0] : memref<8x32xf32, #tpu.memory_space<vmem>>, vector<8x32xf32>
    %c0_1 = arith.constant 0 : index
    %c0_2 = arith.constant 0 : index
    %1 = vector.load %arg1[%c0_1, %c0_2] : memref<32x128xf32, #tpu.memory_space<vmem>>, vector<32x128xf32>
    %cst = arith.constant dense<0.000000e+00> : vector<8x128xf32>
    %2 = tpu.matmul %0, %1, %cst {dimension_numbers = #tpu.dot_dimension_numbers<[1], [0], [0], [1], [0, 0, 1, 1], [], []>} : vector<8x32xf32>, vector<32x128xf32>, vector<8x128xf32> -> vector<8x128xf32>
    %c0_3 = arith.constant 0 : index
    %c0_4 = arith.constant 0 : index
    %3 = vector.load %arg2[%c0_3, %c0_4] : memref<1x128xf32, #tpu.memory_space<vmem>>, vector<1x128xf32>
    %4 = vector.broadcast %3 : vector<1x128xf32> to vector<8x128xf32>
    %5 = arith.addf %2, %4 : vector<8x128xf32>
    %cst_5 = arith.constant 0.000000e+00 : f32
    %6 = vector.broadcast %cst_5 : f32 to vector<8x128xf32>
    %7 = arith.maximumf %5, %6 : vector<8x128xf32>
    %c0_6 = arith.constant 0 : index
    %c0_7 = arith.constant 0 : index
    %8 = vector.load %arg3[%c0_6, %c0_7] : memref<128x128xf32, #tpu.memory_space<vmem>>, vector<128x128xf32>
    %cst_8 = arith.constant dense<0.000000e+00> : vector<8x128xf32>
    %9 = tpu.matmul %7, %8, %cst_8 {dimension_numbers = #tpu.dot_dimension_numbers<[1], [0], [0], [1], [0, 0, 1, 1], [], []>} : vector<8x128xf32>, vector<128x128xf32>, vector<8x128xf32> -> vector<8x128xf32>
    %cst_9 = arith.constant 0.000000e+00 : f32
    %10 = vector.broadcast %cst_9 : f32 to vector<8x128xf32>
    %11 = arith.cmpf olt, %9, %10 : vector<8x128xf32>
    %12 = arith.extui %11 : vector<8x128xi1> to vector<8x128xi32>
    %cst_10 = arith.constant dense<0> : vector<8xi32>
    %13 = vector.multi_reduction <add>, %12, %cst_10 [1] : vector<8x128xi32> to vector<8xi32>
    %14 = vector.shape_cast %13 : vector<8xi32> to vector<8x1xi32>
    %c5_i32 = arith.constant 5 : i32
    %15 = vector.broadcast %c5_i32 : i32 to vector<8x1xi32>
    %16 = arith.subi %15, %14 : vector<8x1xi32>
    %c1_i32 = arith.constant 1 : i32
    %17 = vector.broadcast %c1_i32 : i32 to vector<8x1xi32>
    %18 = arith.addi %16, %17 : vector<8x1xi32>
    %c0_11 = arith.constant 0 : index
    %c0_12 = arith.constant 0 : index
    %19 = vector.load %arg4[%c0_11, %c0_12] : memref<8x1xi32, #tpu.memory_space<vmem>>, vector<8x1xi32>
    tpu.vector_store %arg4[%c0_11, %c0_12], %18 {strides = array<i32>} : memref<8x1xi32, #tpu.memory_space<vmem>>, vector<8x1xi32>,
    return
  }
}

</mosaic_0001>

<bundles_post_ra>
// kernel: forward.1
= control target key start
LH: loop header
LB: loop body
LE: loop exit
PB: predicated region body
PF: predicated region fallthrough
CT: control target
= control target key end

     0   :  { %9 = vsyncpa [#allocation3], 0  ;;  %s514_s0 = inlined_call_operand.hbm [shape: f32[8,32], index: 0, kind: input, shape index: {}]   ;;  %s515_s1 = inlined_call_operand.hbm [shape: f32[32,128], index: 1, kind: input, shape index: {}]   ;;  %s516_s2 = inlined_call_operand.vmem [shape: f32[1,128], index: 2, kind: input, shape index: {}]   ;;  %s517_s3 = inlined_call_operand.hbm [shape: f32[128,128], index: 3, kind: input, shape index: {}]   ;;  %s518_s4 = inlined_call_operand.vmem [shape: s32[8,1], index: 4, kind: output, shape index: {}]  }
   0x1   :  { %10 = vsyncpa [#allocation5], 0  ;;  %s432_s15 = smov [#allocation4]   ;;  %s362_s19 = scalar_lea.hbm %s515_s1, 512 }
   0x2   :  { %s26_s16 = sshll.u32 %s432_s15, 4  ;;  %p363_p0 = scmp.ne.s32.totalorder %s515_s1, %s362_s19  ;;  %s27_s16 = int_to_ptr.vmem [resolvable:$true] %s26_s16 }
   0x3   :  { %p366_p1 = scmp.lt.u32.totalorder %s362_s19, %s515_s1 }
   0x5   :  { %p368_p2 = pnand %p366_p1, %p363_p0 }
   0x7   :  { %371 = shalt.err (!%p368_p2)
}
   0x8   :  { %s372_s24 = scalar_lea.vmem %s27_s16, 512  ;;  %p377_p4 = scmp.lt.s32.totalorder %s27_s16, %s27_s16 }
   0x9   :  { %p373_p3 = scmp.ne.s32.totalorder %s27_s16, %s372_s24  ;;  %p378_p5 = scmp.lt.s32.totalorder %s372_s24, %s372_s24 }
   0xb   :  { %p379_p6 = por %p378_p5, %p377_p4 }
   0xd   :  { %p380_p7 = pnand %p379_p6, %p373_p3 }
   0xf   :  { %383 = shalt.err (!%p380_p7)
}
  0x10   :  { %s433_s25 = smov 128   ;;  %s434_s26 = smov 8  }
  0x11   :  { %32 = dma.hbm_to_vmem [thread:$0]  %s515_s1, 512, %s27_s16, [#allocation5], %s433_s25, %s433_s25, %s434_s26  }
  0x12   :  { %s435_s29 = smov [#allocation2]   ;;  %s436_s5 = smov [#allocation6]  }
  0x13   :  { %s17_s30 = sshll.u32 %s435_s29, 4  ;;  %s40_s6 = sshll.u32 %s436_s5, 4  ;;  %s18_s30 = int_to_ptr.vmem [resolvable:$true] %s17_s30  ;;  %s41_s6 = int_to_ptr.vmem [resolvable:$true] %s40_s6 }
  0x14   :  { %s384_s9 = scalar_lea.hbm %s514_s0, 128 }
  0x15   :  { %p385_p8 = scmp.ne.s32.totalorder %s514_s0, %s384_s9  ;;  %p388_p9 = scmp.lt.u32.totalorder %s384_s9, %s514_s0 }
  0x17   :  { %p390_p10 = pnand %p388_p9, %p385_p8 }
  0x19   :  { %393 = shalt.err (!%p390_p10)
}
  0x1a   :  { %s394_s1 = scalar_lea.vmem %s18_s30, 128  ;;  %p399_p12 = scmp.lt.s32.totalorder %s18_s30, %s18_s30 }
  0x1b   :  { %p395_p11 = scmp.ne.s32.totalorder %s18_s30, %s394_s1  ;;  %p400_p13 = scmp.lt.s32.totalorder %s394_s1, %s394_s1 }
  0x1d   :  { %p401_p0 = por %p400_p13, %p399_p12 }
  0x1f   :  { %p402_p1 = pnand %p401_p0, %p395_p11 }
  0x21   :  { %405 = shalt.err (!%p402_p1)
}
  0x22   :  { %20 = dma.hbm_to_vmem [thread:$0]  %s514_s0, 128, %s18_s30, [#allocation3]  }
  0x23   :  { %s406_s18 = scalar_lea.hbm %s517_s3, 2048 }
  0x24   :  { %p407_p2 = scmp.ne.s32.totalorder %s517_s3, %s406_s18  ;;  %p410_p3 = scmp.lt.u32.totalorder %s406_s18, %s517_s3 }
  0x26   :  { %p412_p4 = pnand %p410_p3, %p407_p2 }
  0x28   :  { %415 = shalt.err (!%p412_p4)
}
  0x29   :  { %s416_s23 = scalar_lea.vmem %s41_s6, 2048  ;;  %p421_p6 = scmp.lt.s32.totalorder %s41_s6, %s41_s6 }
  0x2a   :  { %p417_p5 = scmp.ne.s32.totalorder %s41_s6, %s416_s23  ;;  %p422_p7 = scmp.lt.s32.totalorder %s416_s23, %s416_s23 }
  0x2c   :  { %p423_p8 = por %p422_p7, %p421_p6 }
  0x2e   :  { %p424_p9 = pnand %p423_p8, %p417_p5 }
  0x30   :  { %427 = shalt.err (!%p424_p9)
}
  0x31   :  { %46 = dma.hbm_to_vmem [thread:$0]  %s517_s3, 2048, %s41_s6, [#allocation5], %s433_s25, %s433_s25, %s434_s26  }
  0x32   :  { %428 = dma.done.wait [#allocation3], 128  }
  0x33   :  { %429 = vsyncadd [#allocation3], 4294967168 }
  0x34   :  { %430 = dma.done.wait [#allocation5], 2560  }
  0x35   :  { %431 = vsyncadd [#allocation5], 4294964736  ;;  %v437_v0 = vmov 0.0|0.0   ;;  %vm438_vm0 = vmmov 0   ;;  %v439_v1 = vmov 0.0   ;;  %v57_v2 = vld [vmem:[#allocation4] sm:$0xff] }
  0x36   :  { %323 = vmatprep.subr.bf16.mxu0 %v437_v0  ;;  %285 = vmatprep.mubr.msk.f32.mxu0 %vm438_vm0, %v439_v1  ;;  %v58_v3 = vld [vmem:[#allocation4 + $0x8] sm:$0xff]  ;;  %v59_v4 = vld [vmem:[#allocation4 + $0x10] sm:$0xff]  ;;  %v60_v6 = vld [vmem:[#allocation4 + $0x18] sm:$0xff]  ;;  %vm68_vm1 = vcmask 261120   ;;  %v440_v40 = vmov 0   ;;  %vm245_vm3 = vcmask 7168  }
  0x37   :  { %329 = vmatprep.subr.bf16.mxu1 %v437_v0  ;;  %320 = vmatprep.mubr.msk.f32.mxu1 %vm438_vm0, %v439_v1  ;;  %v324_v5 = vpack.c.bf16 %v58_v3, %v57_v2  ;;  %v143_v7 = vld [vmem:[#allocation6] sm:$0xff]  ;;  %v144_v8 = vld [vmem:[#allocation6 + $0x8] sm:$0xff]  ;;  %v145_v9 = vld [vmem:[#allocation6 + $0x10] sm:$0xff]  ;;  %v327_v11 = vpack.c.bf16 %v60_v6, %v59_v4 }
  0x38   :  { %v146_v10 = vld [vmem:[#allocation6 + $0x18] sm:$0xff]  ;;  %v330_v12 = vpack.c.bf16 %v144_v8, %v143_v7  ;;  %v147_v14 = vld [vmem:[#allocation6 + $0x20] sm:$0xff]  ;;  %v148_v15 = vld [vmem:[#allocation6 + $0x28] sm:$0xff] }
  0x39   :  { %325 = vmatpush3.bf16.msra.mxu0 %v324_v5  ;;  %v333_v13 = vpack.c.bf16 %v146_v10, %v145_v9  ;;  %v56_v16 = vld [vmem:[#allocation2] sm:$0xff]  ;;  %v336_v17 = vpack.c.bf16 %v148_v15, %v147_v14  ;;  %v149_v18 = vld [vmem:[#allocation6 + $0x30] sm:$0xff]  ;;  %v151_v21 = vld [vmem:[#allocation6 + $0x40] sm:$0xff] }
  0x3a   :  { %326 = vmatprep.subr.bf16.mxu0 %v437_v0  ;;  %331 = vmatpush3.bf16.msra.mxu1 %v330_v12  ;;  %v150_v19 = vld [vmem:[#allocation6 + $0x38] sm:$0xff]  ;;  %v152_v22 = vld [vmem:[#allocation6 + $0x48] sm:$0xff]  ;;  %v153_v24 = vld [vmem:[#allocation6 + $0x50] sm:$0xff] }
  0x3b   :  { %332 = vmatprep.subr.bf16.mxu1 %v437_v0  ;;  %v339_v20 = vpack.c.bf16 %v150_v19, %v149_v18  ;;  %v342_v23 = vpack.c.bf16 %v152_v22, %v151_v21  ;;  %v154_v25 = vld [vmem:[#allocation6 + $0x58] sm:$0xff]  ;;  %v155_v27 = vld [vmem:[#allocation6 + $0x60] sm:$0xff]  ;;  %v156_v28 = vld [vmem:[#allocation6 + $0x68] sm:$0xff] }
  0x3c   :  { %v345_v26 = vpack.c.bf16 %v154_v25, %v153_v24  ;;  %v348_v29 = vpack.c.bf16 %v156_v28, %v155_v27  ;;  %v157_v30 = vld [vmem:[#allocation6 + $0x70] sm:$0xff]  ;;  %v158_v31 = vld [vmem:[#allocation6 + $0x78] sm:$0xff] }
  0x3d   :  { %328 = vmatpush3.bf16.msra.mxu0 %v327_v11  ;;  %v351_v32 = vpack.c.bf16 %v158_v31, %v157_v30  ;;  %v253_v33 = vld [vmem:[%s516_s2] ss:$0 sm:$0xff] }
  0x3e   :  { %334 = vmatpush3.bf16.msra.mxu1 %v333_v13 }
  0x3f   :  { %335 = vmatprep.subr.bf16.mxu1 %v437_v0 }
  0x40   :  { %286 = vmatmul.mubr.msk.f32.vlgmr.msra.gmra.mrb[0].mxu0 %vm68_vm1, %v56_v16 }
  0x42   :  { %337 = vmatpush3.bf16.msra.mxu1 %v336_v17 }
  0x43   :  { %338 = vmatprep.subr.bf16.mxu1 %v437_v0 }
  0x46   :  { %340 = vmatpush3.bf16.msra.mxu1 %v339_v20 }
  0x47   :  { %341 = vmatprep.subr.bf16.mxu1 %v437_v0 }
  0x4a   :  { %343 = vmatpush3.bf16.msra.mxu1 %v342_v23 }
  0x4b   :  { %344 = vmatprep.subr.bf16.mxu1 %v437_v0 }
  0x4e   :  { %346 = vmatpush3.bf16.msra.mxu1 %v345_v26 }
  0x4f   :  { %347 = vmatprep.subr.bf16.mxu1 %v437_v0 }
  0x52   :  { %349 = vmatpush3.bf16.msra.mxu1 %v348_v29 }
  0x53   :  { %350 = vmatprep.subr.bf16.mxu1 %v437_v0 }
  0x56   :  { %352 = vmatpush3.bf16.msra.mxu1 %v351_v32 }
 0x113   :  { %v138_v34 = vpop.f32.mrb[0].mxu0 }
 0x114   :  { %v139_v35 = vadd.f32 %v253_v33, %v138_v34  ;;  %v287_v36 = vpop.f32.mrb[1].mxu0 }
 0x116   :  { %v142_v37 = vmax.f32 %v139_v35, 0.0 }
 0x118   :  { %321 = vmatmul.mubr.f32.vlgmr.msra.gmra.mrb[0].mxu1 %v142_v37 }
 0x1eb   :  { %v225_v38 = vpop.f32.mrb[0].mxu1 }
 0x1ec   :  { %vm229_vm2 = vcmp.lt.f32.partialorder %v225_v38, 0.0  ;;  %v322_v39 = vpop.f32.mrb[1].mxu1 }
 0x1ed   :  { %v230_v41 = vsel %vm229_vm2, 1, %v440_v40 }
 0x1ee   :  { %v232_v42 = vshrl.u32 %v230_v41, 16  ;;  %v231_v44 = vand.u32 65535, %v230_v41 }
 0x1f0   :  { %v234_v43 = vcvt.s32.f32 %v232_v42  ;;  %v233_v45 = vcvt.s32.f32 %v231_v44 }
 0x1f2   :  { %237 = vadd.xlane.f32.xlu0 %v234_v43 }
 0x1f6   :  { %235 = vadd.xlane.f32.xlu0 %v233_v45 }
 0x27f   :  { %v238_v46 = vpop.xlane.xlu0 %237 }
 0x280   :  { %v240_v47 = vcvt.f32.s32 %v238_v46 }
 0x282   :  { %v241_v49 = vshll.u32 %v240_v47, 16 }
 0x283   :  { %v236_v48 = vpop.xlane.xlu0 %235 }
 0x284   :  { %v239_v50 = vcvt.f32.s32 %v236_v48 }
 0x286   :  { %v242_v51 = vadd.s32 %v241_v49, %v239_v50 }
 0x288   :  { %v243_v52 = vsub.s32 5, %v242_v51 }
 0x28a   :  { %v244_v53 = vadd.s32 1, %v243_v52 }
 0x28c   :  { %246 = vst.msk [vmem:[%s518_s4] sm:$0xff] %vm245_vm3, %v244_v53 }
 0x28d   :  { %251 = vsyncpa [#allocation3], 1 }
 0x28e   :  { %252 = vsyncpa [#allocation5], 1 }

</bundles_post_ra>
